<compile_context>
chip_gen: v6e
topology: v6e:2x2x1
jax: 0.10.0
libtpu: 0.0.40
codegen_flags: <defaults>
</compile_context>

<pallas_src>
import jax
import jax.numpy as jnp
from jax.experimental import pallas as pl
from jax.experimental.pallas import tpu as pltpu


def _round_up(a: int, b: int) -> int:
    return -(-a // b) * b


def _round_down(a: int, b: int) -> int:
    return (a // b) * b


def _chomp_copy_kernel(x_ref, o_ref):
    # The chomp lives in the BlockSpecs; the body is a pure lane-dense copy.
    o_ref[...] = x_ref[...]


def chomp1d(x: jax.Array, chomp_size: int) -> jax.Array:
    """Pallas equivalent of Chomp1d.forward: drop last `chomp_size` along L."""
    assert chomp_size > 0, "chomp_size must be positive (see semantic note)"
    n, c, l = x.shape
    l_out = l - chomp_size
    assert l_out > 0, "chomp_size must be smaller than the length axis"

    rows = n * c
    x2 = x.reshape(rows, l)  # (N*C, L): rows -> sublanes, L -> lanes

    itemsize = jnp.dtype(x.dtype).itemsize
    # Sublane packing: 8 rows/f32, 16 rows/bf16, 32 rows/int8|fp8.
    sublane = {4: 8, 2: 16, 1: 32}.get(itemsize, 8)

    # ---- Column blocking (multiples of 128 lanes, capped) -------------------
    # Cap keeps the double-buffered in+out footprint small even for huge L,
    # while staying far past the ~512-lane point where copy BW flattens.
    COL_CAP = 2048
    l_out_pad = _round_up(l_out, 128)
    col_block = min(l_out_pad, COL_CAP)          # multiple of 128 by construction
    n_col_steps = pl.cdiv(l_out, col_block)

    # ---- Row blocking --------------------------------------------------------
    # VMEM budget for blocks: in + out, each double-buffered (default Buffered(2)).
    # 8 MiB fits the v5e 16 MiB scoped default and leaves headroom on v7x.
    VMEM_BUDGET = 8 * 1024 * 1024
    per_row = 2 * 2 * col_block * itemsize
    max_rows_by_vmem = max(sublane, _round_down(VMEM_BUDGET // per_row, sublane))

    # Aim for >= ~8 total grid steps (pipelining overlap; 2-TC sharding on v7x),
    # but do not shrink row blocks below ~512 rows just to add steps.
    MIN_TOTAL_STEPS = 8
    row_steps_target = max(1, -(-MIN_TOTAL_STEPS // n_col_steps))
    rb_for_steps = _round_up(pl.cdiv(rows, row_steps_target), sublane)
    rb_floor = min(rows, 512)
    row_block = max(rb_for_steps, rb_floor)
    row_block = min(row_block, max_rows_by_vmem, _round_up(rows, sublane))
    row_block = max(sublane, _round_down(row_block, sublane))

    grid = (pl.cdiv(rows, row_block), n_col_steps)

    # Identity block index map for both sides: column block j of the output is
    # exactly column block j of the input (the chomp only drops the tail).
    in_spec = pl.BlockSpec((row_block, col_block), lambda i, j: (i, j))
    out_spec = pl.BlockSpec((row_block, col_block), lambda i, j: (i, j))

    out2 = pl.pallas_call(
        _chomp_copy_kernel,
        out_shape=jax.ShapeDtypeStruct((rows, l_out), x.dtype),
        grid=grid,
        in_specs=[in_spec],
        out_specs=out_spec,
        compiler_params=pltpu.CompilerParams(
            dimension_semantics=("parallel", "parallel"),
        ),
        cost_estimate=pl.CostEstimate(
            flops=0,
            transcendentals=0,
            bytes_accessed=2 * rows * l_out * itemsize,  # one read + one write
        ),
    )(x2)

    return out2.reshape(n, c, l_out)


class Chomp1d:
    """Thin module-style wrapper mirroring the PyTorch API."""

    def __init__(self, chomp_size: int):
        self.chomp_size = chomp_size

    def __call__(self, x: jax.Array) -> jax.Array:
        return chomp1d(x, self.chomp_size)


if __name__ == "__main__":
    key = jax.random.PRNGKey(0)

    # Case 1: small TCN-like shape (L_out = 14, single padded/masked column block).
    N, C, L = 2, 4, 16
    chomp_size = 2
    x = jax.random.normal(key, (N, C, L), dtype=jnp.float32)
    out = jax.block_until_ready(Chomp1d(chomp_size)(x))
    ref = x[:, :, :-chomp_size]
    assert out.shape == ref.shape and out.dtype == ref.dtype
    assert jnp.array_equal(out, ref), "Pallas Chomp1d output mismatch (case 1)"

    # Case 2: lane-aligned L_out (130 - 2 = 128) -> fully dense, unmasked blocks.
    key2 = jax.random.PRNGKey(1)
    x2 = jax.random.normal(key2, (2, 8, 130), dtype=jnp.float32)
    out2 = jax.block_until_ready(chomp1d(x2, 2))
    ref2 = x2[:, :, :-2]
    assert jnp.array_equal(out2, ref2), "Pallas Chomp1d output mismatch (case 2)"

    # Case 3: bigger rows axis + non-aligned L_out -> multi-step row grid with a
    # masked last column block (exercises the 2-D grid path).
    key3 = jax.random.PRNGKey(2)
    x3 = jax.random.normal(key3, (4, 160, 384), dtype=jnp.float32)
    out3 = jax.block_until_ready(chomp1d(x3, 3))
    ref3 = x3[:, :, :-3]
    assert jnp.array_equal(out3, ref3), "Pallas Chomp1d output mismatch (case 3)"

    # Case 4: bf16 (16-row sublane packing path).
    key4 = jax.random.PRNGKey(3)
    x4 = jax.random.normal(key4, (2, 32, 260), dtype=jnp.bfloat16)
    out4 = jax.block_until_ready(chomp1d(x4, 4))
    ref4 = x4[:, :, :-4]
    assert jnp.array_equal(out4, ref4), "Pallas Chomp1d output mismatch (case 4)"

    print("KERNEL_OK")
</pallas_src>

<mosaic_0001>
module attributes {stable_mosaic.version = 11 : i64} {
  func.func @_chomp_copy_kernel(%arg0: i32, %arg1: i32, %arg2: memref<8x128xf32, #tpu.memory_space<vmem>>, %arg3: memref<8x128xf32, #tpu.memory_space<vmem>>) attributes {dimension_semantics = [#tpu.dimension_semantics<parallel>, #tpu.dimension_semantics<parallel>], iteration_bounds = array<i64: 1, 1>, scalar_prefetch = 0 : i64, scratch_operands = 0 : i64, tpu.core_type = #tpu.core_type<tc>, window_params = [{transform_indices = @transform_0, window_bounds = array<i64: 8, 128>}, {transform_indices = @transform_1, window_bounds = array<i64: 8, 128>}]} {
    %c0 = arith.constant 0 : index
    %c0_0 = arith.constant 0 : index
    %0 = vector.load %arg2[%c0, %c0_0] : memref<8x128xf32, #tpu.memory_space<vmem>>, vector<8x128xf32>
    %c0_1 = arith.constant 0 : index
    %c0_2 = arith.constant 0 : index
    %1 = vector.load %arg3[%c0_1, %c0_2] : memref<8x128xf32, #tpu.memory_space<vmem>>, vector<8x128xf32>
    tpu.vector_store %arg3[%c0_1, %c0_2], %0 {strides = array<i32>} : memref<8x128xf32, #tpu.memory_space<vmem>>, vector<8x128xf32>,
    return
  }
  func.func @transform_0(%arg0: i32, %arg1: i32) -> (i32, i32) {
    %c0_i32 = arith.constant 0 : i32
    return %arg0, %arg1 : i32, i32
  }
  func.func @transform_1(%arg0: i32, %arg1: i32) -> (i32, i32) {
    %c0_i32 = arith.constant 0 : i32
    return %arg0, %arg1 : i32, i32
  }
}

</mosaic_0001>

<bundles_post_ra>
// kernel: tpu_custom_call.1
= control target key start
LH: loop header
LB: loop body
LE: loop exit
PB: predicated region body
PF: predicated region fallthrough
CT: control target
= control target key end

     0   :  { %6 = vsyncpa [#allocation3], 0  ;;  %s102_s0 = inlined_call_operand.hbm [shape: f32[8,16], index: 0, kind: input, shape index: {}]   ;;  %s103_s1 = inlined_call_operand.hbm [shape: f32[8,14], index: 1, kind: output, shape index: {}]  }
   0x1   :  { %7 = vsyncpa [#allocation4], 0  ;;  %s84_s6 = smov [#allocation2]  }
   0x2   :  { %s14_s7 = sshll.u32 %s84_s6, 4  ;;  %s15_s7 = int_to_ptr.vmem [resolvable:$true] %s14_s7 }
   0x3   :  { %s48_s8 = scalar_lea.vmem %s15_s7, 128  ;;  %p53_p1 = scmp.lt.s32.totalorder %s15_s7, %s15_s7 }
   0x4   :  { %p49_p0 = scmp.ne.s32.totalorder %s15_s7, %s48_s8  ;;  %p54_p2 = scmp.lt.s32.totalorder %s48_s8, %s48_s8 }
   0x6   :  { %p55_p3 = por %p54_p2, %p53_p1 }
   0x8   :  { %p56_p4 = pnand %p55_p3, %p49_p0 }
   0xa   :  { %59 = shalt.err (!%p56_p4)
}
   0xb   :  { %17 = dma.hbm_to_vmem [thread:$0]  %s102_s0, 128, %s15_s7, [#allocation3]  }
   0xc   :  { %80 = dma.done.wait [#allocation3], 128  }
   0xd   :  { %81 = vsyncadd [#allocation3], 4294967168  ;;  %s85_s11 = smov [#allocation5]   ;;  %v21_v0 = vld [vmem:[#allocation2] sm:$0xff] }
   0xe   :  { %s29_s12 = sshll.u32 %s85_s11, 4  ;;  %22 = vst [vmem:[#allocation5] sm:$0xff] %v21_v0  ;;  %s30_s12 = int_to_ptr.vmem [resolvable:$true] %s29_s12 }
   0xf   :  { %s60_s13 = scalar_lea.vmem %s30_s12, 128  ;;  %p65_p6 = scmp.lt.s32.totalorder %s30_s12, %s30_s12 }
  0x10   :  { %p61_p5 = scmp.ne.s32.totalorder %s30_s12, %s60_s13  ;;  %p66_p7 = scmp.lt.s32.totalorder %s60_s13, %s60_s13 }
  0x12   :  { %p67_p8 = por %p66_p7, %p65_p6 }
  0x14   :  { %p68_p9 = pnand %p67_p8, %p61_p5 }
  0x16   :  { %71 = shalt.err (!%p68_p9)
}
  0x17   :  { %32 = dma.vmem_to_hbm [thread:$0]  %s30_s12, 128, %s103_s1, [#allocation4]  }
  0x18   :  { %82 = dma.done.wait [#allocation4], 128  }
  0x19   :  { %83 = vsyncadd [#allocation4], 4294967168 }
  0x1a   :  { %36 = vsyncpa [#allocation3], 1 }
  0x1b   :  { %37 = vsyncpa [#allocation4], 1 }

</bundles_post_ra>
